<compile_context>
chip_gen: v5e
topology: v5e:2x2
jax: 0.10.0
libtpu: 0.0.40
codegen_flags: <defaults>
</compile_context>

<pallas_src>
import numpy as np
import jax
import jax.numpy as jnp
from jax.experimental import pallas as pl
from jax.experimental.pallas import tpu as pltpu

# ----------------------- FlexMatch hyper-parameters -----------------------
N_CLS = 10
HIDDEN = 32
P_CUTOFF = 0.95
T = 0.5            # unused when hard_label=True (matches reference code path)
LAMBDA_U = 1.0
HARD_LABEL = True
USE_DA = False     # TODO(synk): use_DA branch needs persistent EMA p_model state; not implemented
THRESH_WARMUP = True

LANE = 128
SUBLANE = 8
NEG_INF = -1e30    # finite "-inf" so 0 * NEG_INF stays 0 (no NaN in masked CE)


def _round_up(x, m):
    return ((x + m - 1) // m) * m


def _log_softmax(x):
    m = jnp.max(x, axis=-1, keepdims=True)
    s = x - m
    return s - jnp.log(jnp.sum(jnp.exp(s), axis=-1, keepdims=True))


# =========================== fused Pallas kernel ===========================
def _make_fused_kernel(*, bsz, ub, bsz_pad, ub_pad, tr, sel_lanes):
    inv_bsz = 1.0 / bsz
    inv_ub = 1.0 / ub

    def kernel(x_ref, w1_ref, b1_ref, w2_ref, b2_ref, tgt_ref, acc_ref,
               logits_ref, stats_ref):
        i = pl.program_id(0)
        c_pad = logits_ref.shape[1]

        # ---------- stage 1: MLP logits for this row tile (MXU, bf16 in) ----
        h = jnp.dot(x_ref[...], w1_ref[...], preferred_element_type=jnp.float32)
        h = jnp.maximum(h + b1_ref[...], 0.0)
        logits = jnp.dot(h.astype(jnp.bfloat16), w2_ref[...],
                         preferred_element_type=jnp.float32) + b2_ref[...]
        lane_c = jax.lax.broadcasted_iota(jnp.int32, (tr, c_pad), 1)
        logits = jnp.where(lane_c < N_CLS, logits, NEG_INF)  # mask padded classes
        row0 = pl.multiple_of(i * tr, SUBLANE)
        logits_ref[pl.ds(row0, tr), :] = logits              # resident VMEM slab

        # ---------- stage 2: losses once the whole slab is resident ---------
        @pl.when(i == pl.num_programs(0) - 1)
        def _():
            # supervised CE over the labeled rows (mean over bsz real rows)
            logits_x = logits_ref[0:bsz_pad, :]
            logp_x = _log_softmax(logits_x)
            iota_x = jax.lax.broadcasted_iota(jnp.int32, (bsz_pad, c_pad), 1)
            onehot_x = (iota_x == tgt_ref[...]).astype(jnp.float32)
            valid_x = (jax.lax.broadcasted_iota(jnp.int32, (bsz_pad, 1), 0)
                       < bsz).astype(jnp.float32)
            nll_x = -jnp.sum(onehot_x * logp_x, axis=-1, keepdims=True)
            lx = jnp.sum(nll_x * valid_x) * inv_bsz

            # pseudo labels / dynamic threshold from weak-aug logits
            logits_w = logits_ref[bsz_pad:bsz_pad + ub_pad, :]
            logits_s = logits_ref[bsz_pad + ub_pad:bsz_pad + 2 * ub_pad, :]
            mw = jnp.max(logits_w, axis=-1, keepdims=True)
            sum_ew = jnp.sum(jnp.exp(logits_w - mw), axis=-1, keepdims=True)
            iota_u = jax.lax.broadcasted_iota(jnp.int32, (ub_pad, c_pad), 1)
            max_idx = jnp.min(jnp.where(logits_w == mw, iota_u, c_pad),
                              axis=-1, keepdims=True)         # argmax, first tie
            onehot_u = (iota_u == max_idx).astype(jnp.float32)
            acc_sel = jnp.sum(onehot_u * acc_ref[...], axis=-1, keepdims=True)
            # max_prob = 1/sum_ew.  Cross-multiplied threshold tests: exact,
            # no reciprocal/divide needed (sum_ew > 0, 2 - acc > 0).
            #   max_prob >= p_cutoff*acc/(2-acc)  <=>  (2-acc) >= p_cutoff*acc*sum_ew
            #   max_prob >= p_cutoff              <=>  p_cutoff*sum_ew <= 1
            mask = ((2.0 - acc_sel) >= P_CUTOFF * acc_sel * sum_ew
                    ).astype(jnp.float32)
            select = (P_CUTOFF * sum_ew <= 1.0).astype(jnp.float32)

            logp_s = _log_softmax(logits_s)
            nll_s = -jnp.sum(onehot_u * logp_s, axis=-1, keepdims=True)
            valid_u = (jax.lax.broadcasted_iota(jnp.int32, (ub_pad, 1), 0)
                       < ub).astype(jnp.float32)
            lu = jnp.sum(nll_s * mask * valid_u) * inv_ub * LAMBDA_U

            # ---- pack everything into one lane-dense (8, sel_lanes) tile ----
            # (ub_pad, 1) columns -> (1, sel_lanes) rows via a masked-eye
            # sublane reduce (iota/compare/mul/sum only; no in-kernel transpose)
            eye = (jax.lax.broadcasted_iota(jnp.int32, (ub_pad, sel_lanes), 0)
                   == jax.lax.broadcasted_iota(jnp.int32, (ub_pad, sel_lanes), 1)
                   ).astype(jnp.float32)
            sel_row = jnp.sum(select * eye, axis=0, keepdims=True)
            plb_row = jnp.sum(max_idx.astype(jnp.float32) * eye, axis=0,
                              keepdims=True)
            lane_s = jax.lax.broadcasted_iota(jnp.int32, (1, sel_lanes), 1)
            scal_row = (jnp.where(lane_s == 0, lx + lu, 0.0)
                        + jnp.where(lane_s == 1, lx, 0.0)
                        + jnp.where(lane_s == 2, lu, 0.0))
            sub_s = jax.lax.broadcasted_iota(jnp.int32, (8, sel_lanes), 0)
            stats_ref[...] = (jnp.where(sub_s == 0, scal_row, 0.0)
                              + jnp.where(sub_s == 1, sel_row, 0.0)
                              + jnp.where(sub_s == 2, plb_row, 0.0))

    return kernel


def _flexmatch_fused(x_pad, w1p, b1p, w2p, b2p, tgt_pad, acc_pad, *,
                     bsz, ub, bsz_pad, ub_pad, tr, sel_lanes):
    n_tiled, d_pad = x_pad.shape
    h_pad = w1p.shape[1]
    c_pad = w2p.shape[1]
    kernel = _make_fused_kernel(bsz=bsz, ub=ub, bsz_pad=bsz_pad, ub_pad=ub_pad,
                                tr=tr, sel_lanes=sel_lanes)
    grid_spec = pltpu.PrefetchScalarGridSpec(
        num_scalar_prefetch=0,
        grid=(n_tiled // tr,),
        in_specs=[
            pl.BlockSpec((tr, d_pad), lambda i: (i, 0)),       # X tile (pipelined)
            pl.BlockSpec((d_pad, h_pad), lambda i: (0, 0)),    # W1 (resident, bf16)
            pl.BlockSpec((1, h_pad), lambda i: (0, 0)),        # b1 (f32)
            pl.BlockSpec((h_pad, c_pad), lambda i: (0, 0)),    # W2 (resident, bf16)
            pl.BlockSpec((1, c_pad), lambda i: (0, 0)),        # b2 (f32)
            pl.BlockSpec((bsz_pad, 1), lambda i: (0, 0)),      # targets
            pl.BlockSpec((1, c_pad), lambda i: (0, 0)),        # classwise_acc
        ],
        out_specs=[
            pl.BlockSpec((n_tiled, c_pad), lambda i: (0, 0)),  # logits slab (resident)
            pl.BlockSpec((8, sel_lanes), lambda i: (0, 0)),    # packed stats tile
        ],
    )
    return pl.pallas_call(
        kernel,
        out_shape=(jax.ShapeDtypeStruct((n_tiled, c_pad), jnp.float32),
                   jax.ShapeDtypeStruct((8, sel_lanes), jnp.float32)),
        grid_spec=grid_spec,
        # The loss stage reads every row tile, so the row axis must stay
        # "arbitrary" (the resident logits slab lives on one core).
        # TODO(synk): at large batch, split the MLP into its own "parallel"
        #             row-grid call to exploit both v7x TensorCores.
        compiler_params=pltpu.CompilerParams(
            dimension_semantics=("arbitrary",)),
    )(x_pad, w1p, b1p, w2p, b2p, tgt_pad, acc_pad)


# ======================== param / input preparation ========================
def pad_params(w1, b1, w2, b2):
    """One-time init: zero-pad hidden/class dims to 128 lanes; bf16 matmul
    operands, f32 biases."""
    d, hidden = w1.shape
    n_cls = w2.shape[1]
    d_pad = _round_up(d, LANE)
    h_pad = _round_up(hidden, LANE)
    c_pad = _round_up(n_cls, LANE)
    w1p = jnp.zeros((d_pad, h_pad), jnp.bfloat16).at[:d, :hidden].set(
        w1.astype(jnp.bfloat16))
    b1p = jnp.zeros((1, h_pad), jnp.float32).at[0, :hidden].set(b1)
    w2p = jnp.zeros((h_pad, c_pad), jnp.bfloat16).at[:hidden, :n_cls].set(
        w2.astype(jnp.bfloat16))
    b2p = jnp.zeros((1, c_pad), jnp.float32).at[0, :n_cls].set(b2)
    return w1p, b1p, w2p, b2p


# ============================ forward (jitted) ==============================
@jax.jit
def flexmatch_forward(labeled_data, unlabeled_data, padded_params,
                      selected_label, classwise_acc):
    inputs_x, targets_x = labeled_data
    inputs_u_idx, (inputs_u_w, inputs_u_s) = unlabeled_data
    bsz = inputs_x.shape[0]
    ub = inputs_u_w.shape[0]
    w1p, b1p, w2p, b2p = padded_params
    d_pad = w1p.shape[0]
    c_pad = w2p.shape[1]

    # ---- classwise_acc bookkeeping, fully on-device (no host sync) ----
    n_sel = selected_label.shape[0]
    cls_vals = jnp.arange(-1, N_CLS, dtype=selected_label.dtype)
    counts = jnp.sum(selected_label[None, :] == cls_vals[:, None], axis=1)
    max_all = jnp.max(counts)
    if THRESH_WARMUP:
        denom = jnp.maximum(max_all, 1).astype(jnp.float32)
    else:
        denom = jnp.maximum(jnp.max(counts[1:]), 1).astype(jnp.float32)
    new_acc = counts[1:].astype(jnp.float32) / denom
    classwise_acc = jnp.where(max_all < n_sel, new_acc, classwise_acc)

    # ---- pack inputs [labeled | weak | strong], each segment 8-row aligned ----
    bsz_pad = _round_up(bsz, SUBLANE)
    ub_pad = _round_up(ub, SUBLANE)
    n_seg = bsz_pad + 2 * ub_pad
    tr = n_seg if n_seg <= 128 else 128             # row tile (multiple of 8)
    n_tiled = _round_up(n_seg, tr)
    sel_lanes = max(LANE, _round_up(ub, LANE))

    d = int(np.prod(inputs_x.shape[1:]))
    x_pad = jnp.zeros((n_tiled, d_pad), jnp.bfloat16)
    x_pad = x_pad.at[:bsz, :d].set(inputs_x.reshape(bsz, -1).astype(jnp.bfloat16))
    x_pad = x_pad.at[bsz_pad:bsz_pad + ub, :d].set(
        inputs_u_w.reshape(ub, -1).astype(jnp.bfloat16))
    x_pad = x_pad.at[bsz_pad + ub_pad:bsz_pad + ub_pad + ub, :d].set(
        inputs_u_s.reshape(ub, -1).astype(jnp.bfloat16))
    tgt_pad = jnp.zeros((bsz_pad, 1), jnp.int32).at[:bsz, 0].set(
        targets_x.astype(jnp.int32))
    acc_pad = jnp.zeros((1, c_pad), jnp.float32).at[0, :N_CLS].set(classwise_acc)

    # ---- fused MLP + FlexMatch loss kernel ----
    logits_slab, stats = _flexmatch_fused(
        x_pad, w1p, b1p, w2p, b2p, tgt_pad, acc_pad,
        bsz=bsz, ub=ub, bsz_pad=bsz_pad, ub_pad=ub_pad, tr=tr,
        sel_lanes=sel_lanes)

    logits_x = logits_slab[:bsz, :N_CLS]
    loss, lx, lu = stats[0, 0], stats[0, 1], stats[0, 2]
    select = stats[1, :ub].astype(jnp.int32)
    pseudo_lb = stats[2, :ub].astype(jnp.int32)

    # ---- selected_label scatter update (device-side, jittable) ----
    cur = selected_label[inputs_u_idx]
    new_vals = jnp.where(select == 1, pseudo_lb, cur)
    selected_label = selected_label.at[inputs_u_idx].set(new_vals)

    return loss, lx, lu, logits_x, targets_x, selected_label, classwise_acc


# ================================= main ====================================
if __name__ == "__main__":
    key = jax.random.PRNGKey(0)
    bsz, ub, C, H, W = 2, 2, 4, 16, 16
    D = C * H * W
    k = jax.random.split(key, 8)

    inputs_x = jax.random.normal(k[0], (bsz, C, H, W), jnp.float32)
    inputs_u_w = jax.random.normal(k[1], (ub, C, H, W), jnp.float32)
    inputs_u_s = inputs_u_w + 0.1 * jax.random.normal(k[2], (ub, C, H, W),
                                                      jnp.float32)
    targets_x = jax.random.randint(k[3], (bsz,), 0, N_CLS, jnp.int32)
    inputs_u_idx = jnp.array([1, 4], jnp.int32)

    # deterministic synthetic model (flatten -> linear -> relu) + linear classifier
    w1 = 0.05 * jax.random.normal(k[4], (D, HIDDEN), jnp.float32)
    b1 = jnp.zeros((HIDDEN,), jnp.float32)
    w2 = 0.05 * jax.random.normal(k[5], (HIDDEN, N_CLS), jnp.float32)
    b2 = jnp.zeros((N_CLS,), jnp.float32)
    padded_params = pad_params(w1, b1, w2, b2)   # one-time padding, outside step

    selected_label = jnp.array([-1, 0, 1, -1, 2, 1, -1, 0], jnp.int32)
    classwise_acc = jnp.zeros((N_CLS,), jnp.float32)

    out = flexmatch_forward((inputs_x, targets_x),
                            (inputs_u_idx, (inputs_u_w, inputs_u_s)),
                            padded_params, selected_label, classwise_acc)
    loss, lx, lu, logits_x, tx, new_sel, cw_acc = out
    jax.block_until_ready(out)

    # ---- pure-JAX reference (same bf16-matmul precision as the kernel) ----
    x_all = jnp.concatenate([inputs_x, inputs_u_w, inputs_u_s],
                            0).reshape(bsz + 2 * ub, -1)
    h_ref = jnp.maximum(
        jnp.dot(x_all.astype(jnp.bfloat16), w1.astype(jnp.bfloat16),
                preferred_element_type=jnp.float32) + b1, 0.0)
    logits_ref = jnp.dot(h_ref.astype(jnp.bfloat16), w2.astype(jnp.bfloat16),
                         preferred_element_type=jnp.float32) + b2
    lx_ref = -jnp.mean(jax.nn.log_softmax(logits_ref[:bsz])[jnp.arange(bsz),
                                                            targets_x])
    pw = jax.nn.softmax(logits_ref[bsz:bsz + ub])
    mp, mi = pw.max(-1), pw.argmax(-1)
    acc = cw_acc[mi]
    mask_ref = (mp >= P_CUTOFF * acc / (2.0 - acc)).astype(jnp.float32)
    lls = jax.nn.log_softmax(logits_ref[bsz + ub:])
    lu_ref = jnp.mean(-lls[jnp.arange(ub), mi] * mask_ref) * LAMBDA_U

    np.testing.assert_allclose(float(loss), float(lx_ref + lu_ref),
                               rtol=2e-3, atol=1e-3)
    np.testing.assert_allclose(np.asarray(logits_x),
                               np.asarray(logits_ref[:bsz]),
                               rtol=2e-2, atol=5e-3)

    print("KERNEL_OK")
</pallas_src>

<mosaic_0001>
module attributes {stable_mosaic.version = 11 : i64} {
  func.func @kernel(%arg0: i32, %arg1: memref<24x1024xbf16, #tpu.memory_space<vmem>>, %arg2: memref<1024x128xbf16, #tpu.memory_space<vmem>>, %arg3: memref<1x128xf32, #tpu.memory_space<vmem>>, %arg4: memref<128x128xbf16, #tpu.memory_space<vmem>>, %arg5: memref<1x128xf32, #tpu.memory_space<vmem>>, %arg6: memref<8x1xi32, #tpu.memory_space<vmem>>, %arg7: memref<1x128xf32, #tpu.memory_space<vmem>>, %arg8: memref<24x128xf32, #tpu.memory_space<vmem>>, %arg9: memref<8x128xf32, #tpu.memory_space<vmem>>) attributes {dimension_semantics = [#tpu.dimension_semantics<arbitrary>], iteration_bounds = array<i64: 1>, scalar_prefetch = 0 : i64, scratch_operands = 0 : i64, tpu.core_type = #tpu.core_type<tc>, window_params = [{transform_indices = @transform_0, window_bounds = array<i64: 24, 1024>}, {pipeline_mode = #tpu.pipeline_mode<synchronous>, transform_indices = @transform_1, window_bounds = array<i64: 1024, 128>}, {pipeline_mode = #tpu.pipeline_mode<synchronous>, transform_indices = @transform_2, window_bounds = array<i64: 1, 128>}, {pipeline_mode = #tpu.pipeline_mode<synchronous>, transform_indices = @transform_3, window_bounds = array<i64: 128, 128>}, {pipeline_mode = #tpu.pipeline_mode<synchronous>, transform_indices = @transform_4, window_bounds = array<i64: 1, 128>}, {pipeline_mode = #tpu.pipeline_mode<synchronous>, transform_indices = @transform_5, window_bounds = array<i64: 8, 1>}, {pipeline_mode = #tpu.pipeline_mode<synchronous>, transform_indices = @transform_6, window_bounds = array<i64: 1, 128>}, {pipeline_mode = #tpu.pipeline_mode<synchronous>, transform_indices = @transform_7, window_bounds = array<i64: 24, 128>}, {pipeline_mode = #tpu.pipeline_mode<synchronous>, transform_indices = @transform_8, window_bounds = array<i64: 8, 128>}]} {
    %c0 = arith.constant 0 : index
    %c0_0 = arith.constant 0 : index
    %0 = vector.load %arg1[%c0, %c0_0] : memref<24x1024xbf16, #tpu.memory_space<vmem>>, vector<24x1024xbf16>
    %c0_1 = arith.constant 0 : index
    %c0_2 = arith.constant 0 : index
    %1 = vector.load %arg2[%c0_1, %c0_2] : memref<1024x128xbf16, #tpu.memory_space<vmem>>, vector<1024x128xbf16>
    %cst = arith.constant dense<0.000000e+00> : vector<24x128xf32>
    %2 = tpu.matmul %0, %1, %cst {dimension_numbers = #tpu.dot_dimension_numbers<[1], [0], [0], [1], [0, 0, 1, 1], [], []>} : vector<24x1024xbf16>, vector<1024x128xbf16>, vector<24x128xf32> -> vector<24x128xf32>
    %c0_3 = arith.constant 0 : index
    %c0_4 = arith.constant 0 : index
    %3 = vector.load %arg3[%c0_3, %c0_4] : memref<1x128xf32, #tpu.memory_space<vmem>>, vector<1x128xf32>
    %4 = vector.broadcast %3 : vector<1x128xf32> to vector<24x128xf32>
    %5 = arith.addf %2, %4 : vector<24x128xf32>
    %cst_5 = arith.constant 0.000000e+00 : f32
    %6 = vector.broadcast %cst_5 : f32 to vector<24x128xf32>
    %7 = arith.maximumf %5, %6 : vector<24x128xf32>
    %8 = arith.truncf %7 : vector<24x128xf32> to vector<24x128xbf16>
    %c0_6 = arith.constant 0 : index
    %c0_7 = arith.constant 0 : index
    %9 = vector.load %arg4[%c0_6, %c0_7] : memref<128x128xbf16, #tpu.memory_space<vmem>>, vector<128x128xbf16>
    %cst_8 = arith.constant dense<0.000000e+00> : vector<24x128xf32>
    %10 = tpu.matmul %8, %9, %cst_8 {dimension_numbers = #tpu.dot_dimension_numbers<[1], [0], [0], [1], [0, 0, 1, 1], [], []>} : vector<24x128xbf16>, vector<128x128xbf16>, vector<24x128xf32> -> vector<24x128xf32>
    %c0_9 = arith.constant 0 : index
    %c0_10 = arith.constant 0 : index
    %11 = vector.load %arg5[%c0_9, %c0_10] : memref<1x128xf32, #tpu.memory_space<vmem>>, vector<1x128xf32>
    %12 = vector.broadcast %11 : vector<1x128xf32> to vector<24x128xf32>
    %13 = arith.addf %10, %12 : vector<24x128xf32>
    %14 = tpu.iota {dimensions = array<i32: 1>} : vector<24x128xi32>
    %c10_i32 = arith.constant 10 : i32
    %15 = vector.broadcast %c10_i32 : i32 to vector<24x128xi32>
    %16 = arith.cmpi slt, %14, %15 : vector<24x128xi32>
    %cst_11 = arith.constant -1.000000e+30 : f32
    %17 = vector.broadcast %cst_11 : f32 to vector<24x128xf32>
    %18 = arith.select %16, %13, %17 : vector<24x128xi1>, vector<24x128xf32>
    %c24_i32 = arith.constant 24 : i32
    %19 = arith.muli %arg0, %c24_i32 : i32
    %20 = tpu.assume_multiple %19, 8 : i32
    %21 = arith.index_cast %20 : i32 to index
    %c0_12 = arith.constant 0 : index
    %22 = vector.load %arg8[%21, %c0_12] : memref<24x128xf32, #tpu.memory_space<vmem>>, vector<24x128xf32>
    tpu.vector_store %arg8[%21, %c0_12], %18 {strides = array<i32>} : memref<24x128xf32, #tpu.memory_space<vmem>>, vector<24x128xf32>,
    %c0_i32 = arith.constant 0 : i32
    %23 = arith.cmpi eq, %arg0, %c0_i32 : i32
    %24 = arith.extui %23 : i1 to i32
    %c0_i32_13 = arith.constant 0 : i32
    %25 = arith.cmpi ne, %24, %c0_i32_13 : i32
    scf.if %25 {
      %c0_14 = arith.constant 0 : index
      %c0_15 = arith.constant 0 : index
      %26 = vector.load %arg8[%c0_14, %c0_15] : memref<24x128xf32, #tpu.memory_space<vmem>>, vector<8x128xf32>
      %cst_16 = arith.constant dense<0xFF800000> : vector<8xf32>
      %27 = vector.multi_reduction <maximumf>, %26, %cst_16 [1] : vector<8x128xf32> to vector<8xf32>
      %28 = vector.shape_cast %27 : vector<8xf32> to vector<8x1xf32>
      %29 = vector.broadcast %28 : vector<8x1xf32> to vector<8x128xf32>
      %30 = arith.subf %26, %29 : vector<8x128xf32>
      %31 = math.exp %30 : vector<8x128xf32>
      %cst_17 = arith.constant dense<0.000000e+00> : vector<8xf32>
      %32 = vector.multi_reduction <add>, %31, %cst_17 [1] : vector<8x128xf32> to vector<8xf32>
      %33 = vector.shape_cast %32 : vector<8xf32> to vector<8x1xf32>
      %34 = math.log %33 : vector<8x1xf32>
      %35 = vector.broadcast %34 : vector<8x1xf32> to vector<8x128xf32>
      %36 = arith.subf %30, %35 : vector<8x128xf32>
      %37 = tpu.iota {dimensions = array<i32: 1>} : vector<8x128xi32>
      %c0_18 = arith.constant 0 : index
      %c0_19 = arith.constant 0 : index
      %38 = vector.load %arg6[%c0_18, %c0_19] : memref<8x1xi32, #tpu.memory_space<vmem>>, vector<8x1xi32>
      %39 = vector.broadcast %38 : vector<8x1xi32> to vector<8x128xi32>
      %40 = arith.cmpi eq, %37, %39 : vector<8x128xi32>
      %41 = arith.extui %40 : vector<8x128xi1> to vector<8x128xi32>
      %42 = arith.sitofp %41 : vector<8x128xi32> to vector<8x128xf32>
      %43 = tpu.iota {dimensions = array<i32: 0>} : vector<8x1xi32>
      %c2_i32 = arith.constant 2 : i32
      %44 = vector.broadcast %c2_i32 : i32 to vector<8x1xi32>
      %45 = arith.cmpi slt, %43, %44 : vector<8x1xi32>
      %46 = arith.extui %45 : vector<8x1xi1> to vector<8x1xi32>
      %47 = arith.sitofp %46 : vector<8x1xi32> to vector<8x1xf32>
      %48 = arith.mulf %42, %36 : vector<8x128xf32>
      %cst_20 = arith.constant dense<0.000000e+00> : vector<8xf32>
      %49 = vector.multi_reduction <add>, %48, %cst_20 [1] : vector<8x128xf32> to vector<8xf32>
      %50 = vector.shape_cast %49 : vector<8xf32> to vector<8x1xf32>
      %cst_21 = arith.constant 0.000000e+00 : f32
      %51 = vector.broadcast %cst_21 : f32 to vector<8x1xf32>
      %52 = arith.subf %51, %50 : vector<8x1xf32>
      %53 = arith.mulf %52, %47 : vector<8x1xf32>
      %54 = vector.shape_cast %53 : vector<8x1xf32> to vector<1x8x1xf32>
      %cst_22 = arith.constant dense<0.000000e+00> : vector<1xf32>
      %55 = vector.multi_reduction <add>, %54, %cst_22 [1, 2] : vector<1x8x1xf32> to vector<1xf32>
      %56 = vector.shape_cast %55 : vector<1xf32> to vector<1x1x1xf32>
      %57 = vector.extract %56[0, 0, 0] : f32 from vector<1x1x1xf32>
      %cst_23 = arith.constant 5.000000e-01 : f32
      %58 = arith.mulf %57, %cst_23 : f32
      %c8 = arith.constant 8 : index
      %c0_24 = arith.constant 0 : index
      %59 = vector.load %arg8[%c8, %c0_24] : memref<24x128xf32, #tpu.memory_space<vmem>>, vector<8x128xf32>
      %c16 = arith.constant 16 : index
      %c0_25 = arith.constant 0 : index
      %60 = vector.load %arg8[%c16, %c0_25] : memref<24x128xf32, #tpu.memory_space<vmem>>, vector<8x128xf32>
      %cst_26 = arith.constant dense<0xFF800000> : vector<8xf32>
      %61 = vector.multi_reduction <maximumf>, %59, %cst_26 [1] : vector<8x128xf32> to vector<8xf32>
      %62 = vector.shape_cast %61 : vector<8xf32> to vector<8x1xf32>
      %63 = vector.broadcast %62 : vector<8x1xf32> to vector<8x128xf32>
      %64 = arith.subf %59, %63 : vector<8x128xf32>
      %65 = math.exp %64 : vector<8x128xf32>
      %cst_27 = arith.constant dense<0.000000e+00> : vector<8xf32>
      %66 = vector.multi_reduction <add>, %65, %cst_27 [1] : vector<8x128xf32> to vector<8xf32>
      %67 = vector.shape_cast %66 : vector<8xf32> to vector<8x1xf32>
      %68 = tpu.iota {dimensions = array<i32: 1>} : vector<8x128xi32>
      %69 = vector.broadcast %62 : vector<8x1xf32> to vector<8x128xf32>
      %70 = arith.cmpf oeq, %59, %69 : vector<8x128xf32>
      %c128_i32 = arith.constant 128 : i32
      %71 = vector.broadcast %c128_i32 : i32 to vector<8x128xi32>
      %72 = arith.select %70, %68, %71 : vector<8x128xi1>, vector<8x128xi32>
      %cst_28 = arith.constant dense<2147483647> : vector<8xi32>
      %73 = vector.multi_reduction <minsi>, %72, %cst_28 [1] : vector<8x128xi32> to vector<8xi32>
      %74 = vector.shape_cast %73 : vector<8xi32> to vector<8x1xi32>
      %75 = vector.broadcast %74 : vector<8x1xi32> to vector<8x128xi32>
      %76 = arith.cmpi eq, %68, %75 : vector<8x128xi32>
      %77 = arith.extui %76 : vector<8x128xi1> to vector<8x128xi32>
      %78 = arith.sitofp %77 : vector<8x128xi32> to vector<8x128xf32>
      %c0_29 = arith.constant 0 : index
      %c0_30 = arith.constant 0 : index
      %79 = vector.load %arg7[%c0_29, %c0_30] : memref<1x128xf32, #tpu.memory_space<vmem>>, vector<1x128xf32>
      %80 = vector.broadcast %79 : vector<1x128xf32> to vector<8x128xf32>
      %81 = arith.mulf %78, %80 : vector<8x128xf32>
      %cst_31 = arith.constant dense<0.000000e+00> : vector<8xf32>
      %82 = vector.multi_reduction <add>, %81, %cst_31 [1] : vector<8x128xf32> to vector<8xf32>
      %83 = vector.shape_cast %82 : vector<8xf32> to vector<8x1xf32>
      %cst_32 = arith.constant 2.000000e+00 : f32
      %84 = vector.broadcast %cst_32 : f32 to vector<8x1xf32>
      %85 = arith.subf %84, %83 : vector<8x1xf32>
      %cst_33 = arith.constant 0.949999988 : f32
      %86 = vector.broadcast %cst_33 : f32 to vector<8x1xf32>
      %87 = arith.mulf %86, %83 : vector<8x1xf32>
      %88 = arith.mulf %87, %67 : vector<8x1xf32>
      %89 = arith.cmpf oge, %85, %88 : vector<8x1xf32>
      %90 = arith.extui %89 : vector<8x1xi1> to vector<8x1xi32>
      %91 = arith.sitofp %90 : vector<8x1xi32> to vector<8x1xf32>
      %cst_34 = arith.constant 0.949999988 : f32
      %92 = vector.broadcast %cst_34 : f32 to vector<8x1xf32>
      %93 = arith.mulf %92, %67 : vector<8x1xf32>
      %cst_35 = arith.constant 1.000000e+00 : f32
      %94 = vector.broadcast %cst_35 : f32 to vector<8x1xf32>
      %95 = arith.cmpf ole, %93, %94 : vector<8x1xf32>
      %96 = arith.extui %95 : vector<8x1xi1> to vector<8x1xi32>
      %97 = arith.sitofp %96 : vector<8x1xi32> to vector<8x1xf32>
      %cst_36 = arith.constant dense<0xFF800000> : vector<8xf32>
      %98 = vector.multi_reduction <maximumf>, %60, %cst_36 [1] : vector<8x128xf32> to vector<8xf32>
      %99 = vector.shape_cast %98 : vector<8xf32> to vector<8x1xf32>
      %100 = vector.broadcast %99 : vector<8x1xf32> to vector<8x128xf32>
      %101 = arith.subf %60, %100 : vector<8x128xf32>
      %102 = math.exp %101 : vector<8x128xf32>
      %cst_37 = arith.constant dense<0.000000e+00> : vector<8xf32>
      %103 = vector.multi_reduction <add>, %102, %cst_37 [1] : vector<8x128xf32> to vector<8xf32>
      %104 = vector.shape_cast %103 : vector<8xf32> to vector<8x1xf32>
      %105 = math.log %104 : vector<8x1xf32>
      %106 = vector.broadcast %105 : vector<8x1xf32> to vector<8x128xf32>
      %107 = arith.subf %101, %106 : vector<8x128xf32>
      %108 = arith.mulf %78, %107 : vector<8x128xf32>
      %cst_38 = arith.constant dense<0.000000e+00> : vector<8xf32>
      %109 = vector.multi_reduction <add>, %108, %cst_38 [1] : vector<8x128xf32> to vector<8xf32>
      %110 = vector.shape_cast %109 : vector<8xf32> to vector<8x1xf32>
      %cst_39 = arith.constant 0.000000e+00 : f32
      %111 = vector.broadcast %cst_39 : f32 to vector<8x1xf32>
      %112 = arith.subf %111, %110 : vector<8x1xf32>
      %113 = tpu.iota {dimensions = array<i32: 0>} : vector<8x1xi32>
      %c2_i32_40 = arith.constant 2 : i32
      %114 = vector.broadcast %c2_i32_40 : i32 to vector<8x1xi32>
      %115 = arith.cmpi slt, %113, %114 : vector<8x1xi32>
      %116 = arith.extui %115 : vector<8x1xi1> to vector<8x1xi32>
      %117 = arith.sitofp %116 : vector<8x1xi32> to vector<8x1xf32>
      %118 = arith.mulf %112, %91 : vector<8x1xf32>
      %119 = arith.mulf %118, %117 : vector<8x1xf32>
      %120 = vector.shape_cast %119 : vector<8x1xf32> to vector<1x8x1xf32>
      %cst_41 = arith.constant dense<0.000000e+00> : vector<1xf32>
      %121 = vector.multi_reduction <add>, %120, %cst_41 [1, 2] : vector<1x8x1xf32> to vector<1xf32>
      %122 = vector.shape_cast %121 : vector<1xf32> to vector<1x1x1xf32>
      %123 = vector.extract %122[0, 0, 0] : f32 from vector<1x1x1xf32>
      %cst_42 = arith.constant 5.000000e-01 : f32
      %124 = arith.mulf %123, %cst_42 : f32
      %cst_43 = arith.constant 1.000000e+00 : f32
      %125 = arith.mulf %124, %cst_43 : f32
      %126 = tpu.iota {dimensions = array<i32: 0>} : vector<8x128xi32>
      %127 = tpu.iota {dimensions = array<i32: 1>} : vector<8x128xi32>
      %128 = arith.cmpi eq, %126, %127 : vector<8x128xi32>
      %129 = arith.extui %128 : vector<8x128xi1> to vector<8x128xi32>
      %130 = arith.sitofp %129 : vector<8x128xi32> to vector<8x128xf32>
      %131 = vector.broadcast %97 : vector<8x1xf32> to vector<8x128xf32>
      %132 = arith.mulf %131, %130 : vector<8x128xf32>
      %cst_44 = arith.constant dense<0.000000e+00> : vector<128xf32>
      %133 = vector.multi_reduction <add>, %132, %cst_44 [0] : vector<8x128xf32> to vector<128xf32>
      %134 = vector.shape_cast %133 : vector<128xf32> to vector<1x128xf32>
      %135 = arith.sitofp %74 : vector<8x1xi32> to vector<8x1xf32>
      %136 = vector.broadcast %135 : vector<8x1xf32> to vector<8x128xf32>
      %137 = arith.mulf %136, %130 : vector<8x128xf32>
      %cst_45 = arith.constant dense<0.000000e+00> : vector<128xf32>
      %138 = vector.multi_reduction <add>, %137, %cst_45 [0] : vector<8x128xf32> to vector<128xf32>
      %139 = vector.shape_cast %138 : vector<128xf32> to vector<1x128xf32>
      %140 = tpu.iota {dimensions = array<i32: 1>} : vector<1x128xi32>
      %c0_i32_46 = arith.constant 0 : i32
      %141 = vector.broadcast %c0_i32_46 : i32 to vector<1x128xi32>
      %142 = arith.cmpi eq, %140, %141 : vector<1x128xi32>
      %143 = arith.addf %58, %125 : f32
      %cst_47 = arith.constant 0.000000e+00 : f32
      %144 = vector.broadcast %143 : f32 to vector<1x128xf32>
      %145 = vector.broadcast %cst_47 : f32 to vector<1x128xf32>
      %146 = arith.select %142, %144, %145 : vector<1x128xi1>, vector<1x128xf32>
      %c1_i32 = arith.constant 1 : i32
      %147 = vector.broadcast %c1_i32 : i32 to vector<1x128xi32>
      %148 = arith.cmpi eq, %140, %147 : vector<1x128xi32>
      %cst_48 = arith.constant 0.000000e+00 : f32
      %149 = vector.broadcast %58 : f32 to vector<1x128xf32>
      %150 = vector.broadcast %cst_48 : f32 to vector<1x128xf32>
      %151 = arith.select %148, %149, %150 : vector<1x128xi1>, vector<1x128xf32>
      %152 = arith.addf %146, %151 : vector<1x128xf32>
      %c2_i32_49 = arith.constant 2 : i32
      %153 = vector.broadcast %c2_i32_49 : i32 to vector<1x128xi32>
      %154 = arith.cmpi eq, %140, %153 : vector<1x128xi32>
      %cst_50 = arith.constant 0.000000e+00 : f32
      %155 = vector.broadcast %125 : f32 to vector<1x128xf32>
      %156 = vector.broadcast %cst_50 : f32 to vector<1x128xf32>
      %157 = arith.select %154, %155, %156 : vector<1x128xi1>, vector<1x128xf32>
      %158 = arith.addf %152, %157 : vector<1x128xf32>
      %159 = tpu.iota {dimensions = array<i32: 0>} : vector<8x128xi32>
      %c0_i32_51 = arith.constant 0 : i32
      %160 = vector.broadcast %c0_i32_51 : i32 to vector<8x128xi32>
      %161 = arith.cmpi eq, %159, %160 : vector<8x128xi32>
      %cst_52 = arith.constant 0.000000e+00 : f32
      %162 = vector.shape_cast %158 : vector<1x128xf32> to vector<1x128xf32>
      %163 = vector.broadcast %162 : vector<1x128xf32> to vector<8x128xf32>
      %164 = vector.broadcast %cst_52 : f32 to vector<8x128xf32>
      %165 = arith.select %161, %163, %164 : vector<8x128xi1>, vector<8x128xf32>
      %c1_i32_53 = arith.constant 1 : i32
      %166 = vector.broadcast %c1_i32_53 : i32 to vector<8x128xi32>
      %167 = arith.cmpi eq, %159, %166 : vector<8x128xi32>
      %cst_54 = arith.constant 0.000000e+00 : f32
      %168 = vector.shape_cast %134 : vector<1x128xf32> to vector<1x128xf32>
      %169 = vector.broadcast %168 : vector<1x128xf32> to vector<8x128xf32>
      %170 = vector.broadcast %cst_54 : f32 to vector<8x128xf32>
      %171 = arith.select %167, %169, %170 : vector<8x128xi1>, vector<8x128xf32>
      %172 = arith.addf %165, %171 : vector<8x128xf32>
      %c2_i32_55 = arith.constant 2 : i32
      %173 = vector.broadcast %c2_i32_55 : i32 to vector<8x128xi32>
      %174 = arith.cmpi eq, %159, %173 : vector<8x128xi32>
      %cst_56 = arith.constant 0.000000e+00 : f32
      %175 = vector.shape_cast %139 : vector<1x128xf32> to vector<1x128xf32>
      %176 = vector.broadcast %175 : vector<1x128xf32> to vector<8x128xf32>
      %177 = vector.broadcast %cst_56 : f32 to vector<8x128xf32>
      %178 = arith.select %174, %176, %177 : vector<8x128xi1>, vector<8x128xf32>
      %179 = arith.addf %172, %178 : vector<8x128xf32>
      %c0_57 = arith.constant 0 : index
      %c0_58 = arith.constant 0 : index
      %180 = vector.load %arg9[%c0_57, %c0_58] : memref<8x128xf32, #tpu.memory_space<vmem>>, vector<8x128xf32>
      tpu.vector_store %arg9[%c0_57, %c0_58], %179 {strides = array<i32>} : memref<8x128xf32, #tpu.memory_space<vmem>>, vector<8x128xf32>,
    } else {
    }
    return
  }
  func.func @transform_0(%arg0: i32) -> (i32, i32) {
    %c0_i32 = arith.constant 0 : i32
    %c0_i32_0 = arith.constant 0 : i32
    return %arg0, %c0_i32 : i32, i32
  }
  func.func @transform_1(%arg0: i32) -> (i32, i32) {
    %c0_i32 = arith.constant 0 : i32
    %c0_i32_0 = arith.constant 0 : i32
    %c0_i32_1 = arith.constant 0 : i32
    return %c0_i32, %c0_i32_0 : i32, i32
  }
  func.func @transform_2(%arg0: i32) -> (i32, i32) {
    %c0_i32 = arith.constant 0 : i32
    %c0_i32_0 = arith.constant 0 : i32
    %c0_i32_1 = arith.constant 0 : i32
    return %c0_i32, %c0_i32_0 : i32, i32
  }
  func.func @transform_3(%arg0: i32) -> (i32, i32) {
    %c0_i32 = arith.constant 0 : i32
    %c0_i32_0 = arith.constant 0 : i32
    %c0_i32_1 = arith.constant 0 : i32
    return %c0_i32, %c0_i32_0 : i32, i32
  }
  func.func @transform_4(%arg0: i32) -> (i32, i32) {
    %c0_i32 = arith.constant 0 : i32
    %c0_i32_0 = arith.constant 0 : i32
    %c0_i32_1 = arith.constant 0 : i32
    return %c0_i32, %c0_i32_0 : i32, i32
  }
  func.func @transform_5(%arg0: i32) -> (i32, i32) {
    %c0_i32 = arith.constant 0 : i32
    %c0_i32_0 = arith.constant 0 : i32
    %c0_i32_1 = arith.constant 0 : i32
    return %c0_i32, %c0_i32_0 : i32, i32
  }
  func.func @transform_6(%arg0: i32) -> (i32, i32) {
    %c0_i32 = arith.constant 0 : i32
    %c0_i32_0 = arith.constant 0 : i32
    %c0_i32_1 = arith.constant 0 : i32
    return %c0_i32, %c0_i32_0 : i32, i32
  }
  func.func @transform_7(%arg0: i32) -> (i32, i32) {
    %c0_i32 = arith.constant 0 : i32
    %c0_i32_0 = arith.constant 0 : i32
    %c0_i32_1 = arith.constant 0 : i32
    return %c0_i32, %c0_i32_0 : i32, i32
  }
  func.func @transform_8(%arg0: i32) -> (i32, i32) {
    %c0_i32 = arith.constant 0 : i32
    %c0_i32_0 = arith.constant 0 : i32
    %c0_i32_1 = arith.constant 0 : i32
    return %c0_i32, %c0_i32_0 : i32, i32
  }
}

</mosaic_0001>

<bundles_post_ra>
// kernel: flexmatch_forward.1
= control target key start
LH: loop header
LB: loop body
LE: loop exit
PB: predicated region body
PF: predicated region fallthrough
CT: control target
= control target key end

     0   :  { %14 = vsyncpa [#allocation3], 0  ;;  %s1514_s30 = smov [#allocation2]   ;;  %s1515_s10 = smov 64   ;;  %s1700_s0 = inlined_call_operand.vmem [shape: bf16[24,1024], index: 0, kind: input, shape index: {}]   ;;  %s1701_s1 = inlined_call_operand.hbm [shape: bf16[1024,128], index: 1, kind: input, shape index: {}]   ;;  %s1702_s2 = inlined_call_operand.vmem [shape: f32[1,128], index: 2, kind: input, shape index: {}]   ;;  %s1703_s3 = inlined_call_operand.vmem [shape: bf16[128,128], index: 3, kind: input, shape index: {}]   ;;  %s1704_s4 = inlined_call_operand.vmem [shape: f32[1,128], index: 4, kind: input, shape index: {}]   ;;  %s1705_s5 = inlined_call_operand.vmem [shape: s32[8,1], index: 5, kind: input, shape index: {}]   ;;  %s1706_s6 = inlined_call_operand.vmem [shape: f32[1,128], index: 6, kind: input, shape index: {}]   ;;  %s1707_s7 = inlined_call_operand.vmem [shape: f32[24,128], index: 7, kind: output, shape index: {0}]   ;;  %s1708_s8 = inlined_call_operand.vmem [shape: f32[8,128], index: 8, kind: output, shape index: {1}]  }
   0x1   :  { %s21_s29 = sshll.u32 %s1701_s1, 4  ;;  %s23_s9 = sshll.u32 %s1514_s30, 4  ;;  %s22_s29 = int_to_ptr.hbm [resolvable:$true] %s21_s29  ;;  %s24_s9 = int_to_ptr.vmem [resolvable:$true] %s23_s9 }
   0x2   :  { %s1516_s11 = smov 4  }
   0x3   :  { %29 = dma.hbm_to_vmem [thread:$0]  %s22_s29, 8192, %s24_s9, [#allocation3], %s1515_s10, %s1515_s10, %s1516_s11  }
   0x4   :  { %1512 = dma.done.wait [#allocation3], 8192  }
   0x5   :  { %1513 = vsyncadd [#allocation3], 4294959104  ;;  %v1391_v0 = vld [vmem:[#allocation2 + $0x38] sm:$0xff]  ;;  %v1390_v4 = vld [vmem:[#allocation2 + $0x30] sm:$0xff]  ;;  %vm918_vm6 = vcmask 7168  }
   0x6   :  { %v1399_v1 = vld [vmem:[#allocation2 + $0x78] sm:$0xff]  ;;  %640 = vmatpush.bf16.msra.mxu0 %v1391_v0  ;;  %v1398_v5 = vld [vmem:[#allocation2 + $0x70] sm:$0xff]  ;;  %v1389_v8 = vld [vmem:[#allocation2 + $0x28] sm:$0xff] }
   0x7   :  { %v1407_v2 = vld [vmem:[#allocation2 + $0xb8] sm:$0xff]  ;;  %658 = vmatpush.bf16.msra.mxu1 %v1399_v1  ;;  %v1406_v6 = vld [vmem:[#allocation2 + $0xb0] sm:$0xff]  ;;  %v1397_v9 = vld [vmem:[#allocation2 + $0x68] sm:$0xff] }
   0x8   :  { %v1415_v3 = vld [vmem:[#allocation2 + $0xf8] sm:$0xff]  ;;  %676 = vmatpush.bf16.msra.mxu2 %v1407_v2  ;;  %v1414_v7 = vld [vmem:[#allocation2 + $0xf0] sm:$0xff]  ;;  %v1405_v10 = vld [vmem:[#allocation2 + $0xa8] sm:$0xff] }
   0x9   :  { %694 = vmatpush.bf16.msra.mxu3 %v1415_v3  ;;  %v1413_v11 = vld [vmem:[#allocation2 + $0xe8] sm:$0xff]  ;;  %v1388_v12 = vld [vmem:[#allocation2 + $0x20] sm:$0xff]  ;;  %v1387_v16 = vld [vmem:[#allocation2 + $0x18] sm:$0xff] }
   0xa   :  { %641 = vmatpush.bf16.msra.mxu0 %v1390_v4  ;;  %v1396_v13 = vld [vmem:[#allocation2 + $0x60] sm:$0xff]  ;;  %v1395_v17 = vld [vmem:[#allocation2 + $0x58] sm:$0xff]  ;;  %v1386_v20 = vld [vmem:[#allocation2 + $0x10] sm:$0xff] }
   0xb   :  { %659 = vmatpush.bf16.msra.mxu1 %v1398_v5  ;;  %v1404_v14 = vld [vmem:[#allocation2 + $0xa0] sm:$0xff]  ;;  %v1403_v18 = vld [vmem:[#allocation2 + $0x98] sm:$0xff]  ;;  %v1394_v21 = vld [vmem:[#allocation2 + $0x50] sm:$0xff] }
   0xc   :  { %677 = vmatpush.bf16.msra.mxu2 %v1406_v6  ;;  %v1412_v15 = vld [vmem:[#allocation2 + $0xe0] sm:$0xff]  ;;  %v1411_v19 = vld [vmem:[#allocation2 + $0xd8] sm:$0xff]  ;;  %v1402_v22 = vld [vmem:[#allocation2 + $0x90] sm:$0xff] }
   0xd   :  { %695 = vmatpush.bf16.msra.mxu3 %v1414_v7  ;;  %v1410_v23 = vld [vmem:[#allocation2 + $0xd0] sm:$0xff]  ;;  %v1385_v24 = vld [vmem:[#allocation2 + $0x8] sm:$0xff]  ;;  %v1384_v28 = vld [vmem:[#allocation2] sm:$0xff] }
   0xe   :  { %642 = vmatpush.bf16.msra.mxu0 %v1389_v8  ;;  %v1393_v25 = vld [vmem:[#allocation2 + $0x48] sm:$0xff]  ;;  %v1392_v29 = vld [vmem:[#allocation2 + $0x40] sm:$0xff]  ;;  %v1439_v40 = vld [vmem:[#allocation2 + $0x1b8] sm:$0xff] }
   0xf   :  { %660 = vmatpush.bf16.msra.mxu1 %v1397_v9  ;;  %v1401_v26 = vld [vmem:[#allocation2 + $0x88] sm:$0xff]  ;;  %v1400_v30 = vld [vmem:[#allocation2 + $0x80] sm:$0xff]  ;;  %v1423_v41 = vld [vmem:[#allocation2 + $0x138] sm:$0xff] }
  0x10   :  { %678 = vmatpush.bf16.msra.mxu2 %v1405_v10  ;;  %v1409_v27 = vld [vmem:[#allocation2 + $0xc8] sm:$0xff]  ;;  %v1408_v31 = vld [vmem:[#allocation2 + $0xc0] sm:$0xff]  ;;  %v1431_v46 = vld [vmem:[#allocation2 + $0x178] sm:$0xff] }
  0x11   :  { %696 = vmatpush.bf16.msra.mxu3 %v1413_v11  ;;  %v1052_v32 = vld [vmem:[%s1700_s0] sm:$0xf]  ;;  %v1376_v34 = vld [vmem:[%s1700_s0 + $0x4] sm:$0xf]  ;;  %v1060_v36 = vld [vmem:[%s1700_s0 + $0x8] sm:$0xf] }
  0x12   :  { %643 = vmatpush.bf16.msra.mxu0 %v1388_v12  ;;  %v1380_v33 = vld [vmem:[%s1700_s0 + $0x1c] sm:$0xf0]  ;;  %v1054_v35 = vld [vmem:[%s1700_s0 + $0x20] sm:$0xf0]  ;;  %v1381_v37 = vld [vmem:[%s1700_s0 + $0x24] sm:$0xf0] }
  0x13   :  { %661 = vmatpush.bf16.msra.mxu1 %v1396_v13  ;;  %v1377_v38 = vld [vmem:[%s1700_s0 + $0xc] sm:$0xf]  ;;  %v1053_v42 = vor.u32 %v1380_v33, %v1052_v32  ;;  %v1057_v43 = vor.u32 %v1376_v34, %v1054_v35  ;;  %v1061_v44 = vor.u32 %v1381_v37, %v1060_v36  ;;  %v1447_v47 = vld [vmem:[#allocation2 + $0x1f8] sm:$0xff]  ;;  %v1438_v48 = vld [vmem:[#allocation2 + $0x1b0] sm:$0xff] }
  0x14   :  { %679 = vmatpush.bf16.msra.mxu2 %v1404_v14  ;;  %v1062_v39 = vld [vmem:[%s1700_s0 + $0x28] sm:$0xf0]  ;;  %v1422_v49 = vld [vmem:[#allocation2 + $0x130] sm:$0xff]  ;;  %v52_v54 = vld [vmem:[%s1700_s0 + $0x40] sm:$0xff] }
  0x15   :  { %697 = vmatpush.bf16.msra.mxu3 %v1412_v15  ;;  %v1065_v45 = vor.u32 %v1377_v38, %v1062_v39  ;;  %v1430_v50 = vld [vmem:[#allocation2 + $0x170] sm:$0xff]  ;;  %v1437_v52 = vld [vmem:[#allocation2 + $0x1a8] sm:$0xff]  ;;  %v1436_v58 = vld [vmem:[#allocation2 + $0x1a0] sm:$0xff]  ;;  %v216_v60 = vunpack.c.l.b16 %v52_v54  ;;  %v217_v61 = vunpack.c.h.b16 %v52_v54 }
  0x16   :  { %644 = vmatpush.bf16.msra.mxu0 %v1387_v16  ;;  %v1446_v51 = vld [vmem:[#allocation2 + $0x1f0] sm:$0xff]  ;;  %v1421_v53 = vld [vmem:[#allocation2 + $0x128] sm:$0xff]  ;;  %v1420_v59 = vld [vmem:[#allocation2 + $0x120] sm:$0xff] }
  0x17   :  { %662 = vmatpush.bf16.msra.mxu1 %v1395_v17  ;;  %v1429_v55 = vld [vmem:[#allocation2 + $0x168] sm:$0xff]  ;;  %v1428_v0 = vld [vmem:[#allocation2 + $0x160] sm:$0xff]  ;;  %v1435_v2 = vld [vmem:[#allocation2 + $0x198] sm:$0xff]  ;;  %v232_v4 = vpack.c.b16 %v216_v60, %v216_v60  ;;  %v233_v5 = vpack.c.b16 %v217_v61, %v217_v61 }
  0x18   :  { %680 = vmatpush.bf16.msra.mxu2 %v1403_v18  ;;  %v1445_v56 = vld [vmem:[#allocation2 + $0x1e8] sm:$0xff]  ;;  %v1444_v1 = vld [vmem:[#allocation2 + $0x1e0] sm:$0xff]  ;;  %v1419_v3 = vld [vmem:[#allocation2 + $0x118] sm:$0xff] }
  0x19   :  { %698 = vmatpush.bf16.msra.mxu3 %v1411_v19  ;;  %v53_v57 = vld [vmem:[%s1700_s0 + $0x48] sm:$0xff]  ;;  %v1427_v8 = vld [vmem:[#allocation2 + $0x158] sm:$0xff]  ;;  %v1434_v10 = vld [vmem:[#allocation2 + $0x190] sm:$0xff] }
  0x1a   :  { %645 = vmatpush.bf16.msra.mxu0 %v1386_v20  ;;  %v218_v62 = vunpack.c.l.b16 %v53_v57  ;;  %v219_v63 = vunpack.c.h.b16 %v53_v57  ;;  %v1443_v9 = vld [vmem:[#allocation2 + $0x1d8] sm:$0xff]  ;;  %v1418_v11 = vld [vmem:[#allocation2 + $0x110] sm:$0xff]  ;;  %v1433_v14 = vld [vmem:[#allocation2 + $0x188] sm:$0xff] }
  0x1b   :  { %663 = vmatpush.bf16.msra.mxu1 %v1394_v21  ;;  %v1426_v12 = vld [vmem:[#allocation2 + $0x150] sm:$0xff]  ;;  %v1417_v15 = vld [vmem:[#allocation2 + $0x108] sm:$0xff]  ;;  %v1432_v18 = vld [vmem:[#allocation2 + $0x180] sm:$0xff] }
  0x1c   :  { %681 = vmatpush.bf16.msra.mxu2 %v1402_v22  ;;  %v234_v6 = vpack.c.b16 %v218_v62, %v218_v62  ;;  %v235_v7 = vpack.c.b16 %v219_v63, %v219_v63  ;;  %v1442_v13 = vld [vmem:[#allocation2 + $0x1d0] sm:$0xff]  ;;  %v1425_v16 = vld [vmem:[#allocation2 + $0x148] sm:$0xff]  ;;  %v1416_v19 = vld [vmem:[#allocation2 + $0x100] sm:$0xff] }
  0x1d   :  { %699 = vmatpush.bf16.msra.mxu3 %v1410_v23  ;;  %v1441_v17 = vld [vmem:[#allocation2 + $0x1c8] sm:$0xff]  ;;  %v1424_v20 = vld [vmem:[#allocation2 + $0x140] sm:$0xff]  ;;  %v1068_v22 = vld [vmem:[%s1700_s0 + $0x10] sm:$0xf] }
  0x1e   :  { %646 = vmatpush.bf16.msra.mxu0 %v1385_v24  ;;  %v1440_v21 = vld [vmem:[#allocation2 + $0x1c0] sm:$0xff]  ;;  %v1382_v23 = vld [vmem:[%s1700_s0 + $0x2c] sm:$0xf0]  ;;  %v1378_v24 = vld [vmem:[%s1700_s0 + $0x14] sm:$0xf] }
  0x1f   :  { %664 = vmatpush.bf16.msra.mxu1 %v1393_v25  ;;  %v1070_v25 = vld [vmem:[%s1700_s0 + $0x30] sm:$0xf0]  ;;  %v55_v35 = vld [vmem:[%s1700_s0 + $0x58] sm:$0xff]  ;;  %v1449_v60 = vld [vmem:[%s1703_s3 + $0x8] sm:$0xff] }
  0x20   :  { %682 = vmatpush.bf16.msra.mxu2 %v1401_v26  ;;  %v1076_v26 = vld [vmem:[%s1700_s0 + $0x18] sm:$0xf]  ;;  %v54_v34 = vld [vmem:[%s1700_s0 + $0x50] sm:$0xff]  ;;  %v222_v37 = vunpack.c.l.b16 %v55_v35  ;;  %v223_v39 = vunpack.c.h.b16 %v55_v35  ;;  %v1475_v61 = vld [vmem:[%s1702_s2] ss:$0 sm:$0xff] }
  0x21   :  { %700 = vmatpush.bf16.msra.mxu3 %v1409_v27  ;;  %v1383_v27 = vld [vmem:[%s1700_s0 + $0x34] sm:$0xf0]  ;;  %v220_v36 = vunpack.c.l.b16 %v54_v34  ;;  %v221_v38 = vunpack.c.h.b16 %v54_v34  ;;  %v1448_v62 = vld [vmem:[%s1703_s3] sm:$0xff] }
  0x22   :  { %647 = vmatpush.bf16.msra.mxu0 %v1384_v28  ;;  %v1379_v28 = vld [vmem:[%s1700_s0 + $0x1c] sm:$0xf]  ;;  %v1077_v32 = vor.u32 %v1383_v27, %v1076_v26 }
  0x23   :  { %665 = vmatpush.bf16.msra.mxu1 %v1392_v29  ;;  %v1078_v29 = vld [vmem:[%s1700_s0 + $0x38] sm:$0xf0] }
  0x24   :  { %683 = vmatpush.bf16.msra.mxu2 %v1400_v30  ;;  %v1069_v30 = vor.u32 %v1382_v23, %v1068_v22  ;;  %v1081_v33 = vor.u32 %v1379_v28, %v1078_v29  ;;  %v1451_v54 = vld [vmem:[%s1703_s3 + $0x18] sm:$0xff] }
  0x25   :  { %701 = vmatpush.bf16.msra.mxu3 %v1408_v31  ;;  %648 = vmatmul.bf16.vlgmr.msra.gmra.mxu0 %v1053_v42  ;;  %v1073_v31 = vor.u32 %v1378_v24, %v1070_v25  ;;  %v237_v42 = vpack.c.b16 %v221_v38, %v221_v38 }
  0x26   :  { %712 = vmatpush.bf16.msrb.mxu0 %v1423_v41  ;;  %666 = vmatmul.bf16.vlgmr.msra.gmra.mxu1 %v1057_v43  ;;  %v238_v41 = vpack.c.b16 %v222_v37, %v222_v37  ;;  %v239_v43 = vpack.c.b16 %v223_v39, %v223_v39 }
  0x27   :  { %684 = vmatmul.bf16.vlgmr.msra.gmra.mxu2 %v1061_v44  ;;  %730 = vmatpush.bf16.msrb.mxu1 %v1431_v46  ;;  %v1455_v44 = vld [vmem:[%s1703_s3 + $0x38] sm:$0xff]  ;;  %v1453_v46 = vld [vmem:[%s1703_s3 + $0x28] sm:$0xff] }
  0x28   :  { %748 = vmatpush.bf16.msrb.mxu2 %v1439_v40  ;;  %702 = vmatmul.bf16.vlgmr.msra.gmra.mxu3 %v1065_v45  ;;  %v236_v40 = vpack.c.b16 %v220_v36, %v220_v36  ;;  %v1454_v45 = vld [vmem:[%s1703_s3 + $0x30] sm:$0xff] }
  0x29   :  { %766 = vmatpush.bf16.msrb.mxu3 %v1447_v47 }
  0x2a   :  { %713 = vmatpush.bf16.msrb.mxu0 %v1422_v49  ;;  %v1452_v49 = vld [vmem:[%s1703_s3 + $0x20] sm:$0xff] }
  0x2b   :  { %731 = vmatpush.bf16.msrb.mxu1 %v1430_v50 }
  0x2c   :  { %749 = vmatpush.bf16.msrb.mxu2 %v1438_v48 }
  0x2d   :  { %767 = vmatpush.bf16.msrb.mxu3 %v1446_v51 }
  0x2e   :  { %714 = vmatpush.bf16.msrb.mxu0 %v1421_v53 }
  0x2f   :  { %732 = vmatpush.bf16.msrb.mxu1 %v1429_v55  ;;  %v1450_v55 = vld [vmem:[%s1703_s3 + $0x10] sm:$0xff] }
  0x30   :  { %750 = vmatpush.bf16.msrb.mxu2 %v1437_v52 }
  0x31   :  { %768 = vmatpush.bf16.msrb.mxu3 %v1445_v56 }
  0x32   :  { %715 = vmatpush.bf16.msrb.mxu0 %v1420_v59 }
  0x33   :  { %733 = vmatpush.bf16.msrb.mxu1 %v1428_v0 }
  0x34   :  { %751 = vmatpush.bf16.msrb.mxu2 %v1436_v58 }
  0x35   :  { %769 = vmatpush.bf16.msrb.mxu3 %v1444_v1  ;;  %653 = vmatmul.bf16.gmra.mxu0 %v232_v4 }
  0x36   :  { %716 = vmatpush.bf16.msrb.mxu0 %v1419_v3  ;;  %671 = vmatmul.bf16.gmra.mxu1 %v233_v5 }
  0x37   :  { %689 = vmatmul.bf16.gmra.mxu2 %v234_v6  ;;  %734 = vmatpush.bf16.msrb.mxu1 %v1427_v8 }
  0x38   :  { %752 = vmatpush.bf16.msrb.mxu2 %v1435_v2  ;;  %707 = vmatmul.bf16.gmra.mxu3 %v235_v7 }
  0x39   :  { %770 = vmatpush.bf16.msrb.mxu3 %v1443_v9 }
  0x3a   :  { %717 = vmatpush.bf16.msrb.mxu0 %v1418_v11 }
  0x3b   :  { %735 = vmatpush.bf16.msrb.mxu1 %v1426_v12 }
  0x3c   :  { %753 = vmatpush.bf16.msrb.mxu2 %v1434_v10 }
  0x3d   :  { %771 = vmatpush.bf16.msrb.mxu3 %v1442_v13 }
  0x3e   :  { %718 = vmatpush.bf16.msrb.mxu0 %v1417_v15 }
  0x3f   :  { %736 = vmatpush.bf16.msrb.mxu1 %v1425_v16 }
  0x40   :  { %754 = vmatpush.bf16.msrb.mxu2 %v1433_v14 }
  0x41   :  { %772 = vmatpush.bf16.msrb.mxu3 %v1441_v17 }
  0x42   :  { %719 = vmatpush.bf16.msrb.mxu0 %v1416_v19 }
  0x43   :  { %737 = vmatpush.bf16.msrb.mxu1 %v1424_v20 }
  0x44   :  { %755 = vmatpush.bf16.msrb.mxu2 %v1432_v18 }
  0x45   :  { %773 = vmatpush.bf16.msrb.mxu3 %v1440_v21  ;;  %720 = vmatmul.bf16.vlgmr.msrb.gmra.mxu0 %v1069_v30 }
  0x46   :  { %738 = vmatmul.bf16.vlgmr.msrb.gmra.mxu1 %v1073_v31  ;;  %857 = vmatpush.bf16.msra.mxu0 %v1455_v44 }
  0x47   :  { %756 = vmatmul.bf16.vlgmr.msrb.gmra.mxu2 %v1077_v32  ;;  %1456 = vmatpush.bf16.msra.mxu1 %v1455_v44 }
  0x48   :  { %774 = vmatmul.bf16.vlgmr.msrb.gmra.mxu3 %v1081_v33 }
  0x4a   :  { %858 = vmatpush.bf16.msra.mxu0 %v1454_v45 }
  0x4b   :  { %1457 = vmatpush.bf16.msra.mxu1 %v1454_v45 }
  0x4e   :  { %859 = vmatpush.bf16.msra.mxu0 %v1453_v46 }
  0x4f   :  { %1458 = vmatpush.bf16.msra.mxu1 %v1453_v46 }
  0x52   :  { %860 = vmatpush.bf16.msra.mxu0 %v1452_v49 }
  0x53   :  { %1459 = vmatpush.bf16.msra.mxu1 %v1452_v49 }
  0x55   :  { %725 = vmatmul.bf16.gmra.mxu0 %v236_v40 }
  0x56   :  { %743 = vmatmul.bf16.gmra.mxu1 %v237_v42  ;;  %861 = vmatpush.bf16.msra.mxu0 %v1451_v54 }
  0x57   :  { %761 = vmatmul.bf16.gmra.mxu2 %v238_v41  ;;  %1460 = vmatpush.bf16.msra.mxu1 %v1451_v54 }
  0x58   :  { %779 = vmatmul.bf16.gmra.mxu3 %v239_v43 }
  0x5a   :  { %862 = vmatpush.bf16.msra.mxu0 %v1450_v55 }
  0x5b   :  { %1461 = vmatpush.bf16.msra.mxu1 %v1450_v55 }
  0x5e   :  { %863 = vmatpush.bf16.msra.mxu0 %v1449_v60 }
  0x5f   :  { %1462 = vmatpush.bf16.msra.mxu1 %v1449_v60 }
  0x62   :  { %864 = vmatpush.bf16.msra.mxu0 %v1448_v62 }
  0x63   :  { %1463 = vmatpush.bf16.msra.mxu1 %v1448_v62 }
  0xa2   :  { %v649_v47 = vpop.f32.mrf.mxu0 }
  0xa3   :  { %v667_v48 = vpop.f32.mrf.mxu1  ;;  %v650_v1 = vadd.f32 %v1475_v61, %v649_v47 }
  0xa5   :  { %v668_v4 = vadd.f32 %v667_v48, %v650_v1 }
  0xaa   :  { %v685_v50 = vpop.f32.mrf.mxu2  ;;  %v651_v52 = vpop.f32.mrf.mxu0 }
  0xab   :  { %v703_v51 = vpop.f32.mrf.mxu3  ;;  %v669_v53 = vpop.f32.mrf.mxu1  ;;  %v652_v5 = vadd.f32 %v1475_v61, %v651_v52  ;;  %v686_v8 = vadd.f32 %v685_v50, %v668_v4  ;;  %v875_v50 = vlaneseq  ;;  %v1476_v52 = vld [vmem:[%s1704_s4] ss:$0 sm:$0xff] }
  0xad   :  { %v670_v11 = vadd.f32 %v669_v53, %v652_v5  ;;  %v704_v12 = vadd.f32 %v703_v51, %v686_v8  ;;  %v1655_v51 = vand.u32 127, %v875_v50 }
  0xaf   :  { %vm877_vm0 = vcmp.lt.s32.totalorder %v1655_v51, 10  ;;  %vm1024_vm10 = vcmp.eq.s32.totalorder %v1655_v51, 1  ;;  %vm1020_vm11 = vcmp.eq.s32.totalorder %v1655_v51, 0  ;;  %vm1028_vm12 = vcmp.eq.s32.totalorder %v1655_v51, 2 }
  0xb2   :  { %v687_v56 = vpop.f32.mrf.mxu2  ;;  %v654_v58 = vpop.f32.mrf.mxu0 }
  0xb3   :  { %v705_v57 = vpop.f32.mrf.mxu3  ;;  %v672_v59 = vpop.f32.mrf.mxu1  ;;  %v688_v13 = vadd.f32 %v687_v56, %v670_v11  ;;  %v655_v14 = vadd.f32 %v1475_v61, %v654_v58 }
  0xb5   :  { %v706_v17 = vadd.f32 %v705_v57, %v688_v13  ;;  %v673_v18 = vadd.f32 %v672_v59, %v655_v14 }
  0xba   :  { %v690_v63 = vpop.f32.mrf.mxu2  ;;  %v656_v2 = vpop.f32.mrf.mxu0 }
  0xbb   :  { %v708_v0 = vpop.f32.mrf.mxu3  ;;  %v674_v3 = vpop.f32.mrf.mxu1  ;;  %v691_v24 = vadd.f32 %v690_v63, %v673_v18  ;;  %v1517_v63 = vmov 0  }
  0xbc   :  { %1473 = vset.pattern.permute.xlu1 %v1517_v63  ;;  %1474 = vset.pattern.permute.xlu0 %v1517_v63 }
  0xbd   :  { %v709_v28 = vadd.f32 %v708_v0, %v691_v24 }
  0xc2   :  { %v692_v6 = vpop.f32.mrf.mxu2  ;;  %v721_v9 = vpop.f32.mrf.mxu0 }
  0xc3   :  { %v710_v7 = vpop.f32.mrf.mxu3  ;;  %v739_v10 = vpop.f32.mrf.mxu1  ;;  %v722_v15 = vadd.f32 %v721_v9, %v704_v12 }
  0xc5   :  { %v740_v22 = vadd.f32 %v739_v10, %v722_v15  ;;  %v901_v15 = vld [vmem:[%s1705_s5] sm:$0xff] }
  0xca   :  { %v757_v16 = vpop.f32.mrf.mxu2  ;;  %v723_v20 = vpop.f32.mrf.mxu0 }
  0xcb   :  { %v775_v19 = vpop.f32.mrf.mxu3  ;;  %v741_v21 = vpop.f32.mrf.mxu1  ;;  %v724_v23 = vadd.f32 %v723_v20, %v706_v17  ;;  %v758_v25 = vadd.f32 %v757_v16, %v740_v22 }
  0xcd   :  { %v742_v26 = vadd.f32 %v741_v21, %v724_v23  ;;  %v776_v29 = vadd.f32 %v775_v19, %v758_v25  ;;  %v1518_v25 = vmov 0.0  }
  0xcf   :  { %v784_v36 = vmax.f32 %v776_v29, 0.0 }
  0xd2   :  { %v759_v27 = vpop.f32.mrf.mxu2  ;;  %v726_v32 = vpop.f32.mrf.mxu0 }
  0xd3   :  { %v760_v30 = vadd.f32 %v759_v27, %v742_v26  ;;  %v777_v31 = vpop.f32.mrf.mxu3  ;;  %v744_v33 = vpop.f32.mrf.mxu1  ;;  %v727_v35 = vadd.f32 %v726_v32, %v709_v28 }
  0xd5   :  { %v778_v34 = vadd.f32 %v777_v31, %v760_v30  ;;  %v745_v39 = vadd.f32 %v744_v33, %v727_v35 }
  0xd7   :  { %v785_v37 = vmax.f32 %v778_v34, 0.0  ;;  %v1477_v34 = vld [vmem:[%s1706_s6] ss:$0 sm:$0xff] }
  0xd9   :  { %v787_v38 = vpack.c.bf16 %v785_v37, %v784_v36 }
  0xda   :  { %v762_v40 = vpop.f32.mrf.mxu2  ;;  %v728_v43 = vpop.f32.mrf.mxu0 }
  0xdb   :  { %v763_v41 = vadd.f32 %v762_v40, %v745_v39  ;;  %865 = vmatmul.bf16.vlgmr.msra.gmra.mxu0 %v787_v38  ;;  %v780_v42 = vpop.f32.mrf.mxu3  ;;  %v746_v44 = vpop.f32.mrf.mxu1 }
  0xdd   :  { %v781_v45 = vadd.f32 %v780_v42, %v763_v41  ;;  %v1682_v42 = vshrl.u32 %v875_v50, 7 }
  0xdf   :  { %v786_v46 = vmax.f32 %v781_v45, 0.0  ;;  %vm910_vm5 = vcmp.lt.s32.totalorder %v1682_v42, 2  ;;  %vm1002_vm8 = vcmp.eq.s32.totalorder %v1682_v42, %v1655_v51  ;;  %vm1032_vm13 = vcmp.eq.s32.totalorder %v1682_v42, 0 }
  0xe0   :  { %v1371_v44 = vsel %vm910_vm5, 1.0, %v1518_v25  ;;  %vm1034_vm14 = vcmp.eq.s32.totalorder %v1682_v42, 1  ;;  %vm1037_vm15 = vcmp.eq.s32.totalorder %v1682_v42, 2 }
  0xe1   :  { %v788_v47 = vpack.c.bf16 %v786_v46, %v786_v46 }
  0xe2   :  { %v764_v48 = vpop.f32.mrf.mxu2 }
  0xe3   :  { %870 = vmatmul.bf16.vlgmr.msra.gmra.mxu1 %v788_v47  ;;  %v782_v49 = vpop.f32.mrf.mxu3 }
 0x158   :  { %v866_v53 = vpop.f32.mrf.mxu0 }
 0x159   :  { %v867_v54 = vadd.f32 %v1476_v52, %v866_v53 }
 0x15b   :  { %v878_v55 = vsel %vm877_vm0, %v867_v54, -1e+30 }
 0x15c   :  { %883 = vst [vmem:[%s1707_s7] sm:$0xff] %v878_v55  ;;  %891 = vmax.xlane.f32.xlu1 %v878_v55 }
 0x160   :  { %v868_v56 = vpop.f32.mrf.mxu0  ;;  %v871_v57 = vpop.f32.mrf.mxu1 }
 0x161   :  { %v869_v58 = vadd.f32 %v1476_v52, %v868_v56  ;;  %v872_v59 = vadd.f32 %v1476_v52, %v871_v57 }
 0x163   :  { %v879_v60 = vsel %vm877_vm0, %v869_v58, -1e+30  ;;  %v880_v61 = vsel %vm877_vm0, %v872_v59, -1e+30 }
 0x164   :  { %884 = vst [vmem:[%s1707_s7 + $0x8] sm:$0xff] %v879_v60  ;;  %932 = vmax.xlane.f32.xlu0 %v879_v60 }
 0x165   :  { %885 = vst [vmem:[%s1707_s7 + $0x10] sm:$0xff] %v880_v61 }
 0x168   :  { %v873_v62 = vpop.f32.mrf.mxu1 }
 0x16c   :  { %975 = vmax.xlane.f32.xlu0 %v880_v61 }
 0x1cf   :  { %v892_v0 = vpop.xlane.xlu1 %891 }
 0x1d0   :  { %v893_v1 = vsub.f32 %v878_v55, %v892_v0 }
 0x1d2   :  { %v894_v2 = vmul.f32 1.442695, %v893_v1 }
 0x1d4   :  { %1478 = vpow2.f32 %v894_v2 }
 0x1d7   :  { %v933_v3 = vpop.xlane.xlu0 %932 }
 0x1d8   :  { %v934_v4 = vsub.f32 %v879_v60, %v933_v3  ;;  %vm939_vm1 = vcmp.eq.f32.partialorder %v879_v60, %v933_v3 }
 0x1d9   :  { %v940_v5 = vsel %vm939_vm1, %v1655_v51, 128 }
 0x1da   :  { %v1479_v6 = vpop.eup %1478  ;;  %v935_v7 = vmul.f32 1.442695, %v934_v4  ;;  %v942_v8 = vshra.s32 %v940_v5, 16  ;;  %v941_v16 = vand.u32 65535, %v940_v5 }
 0x1db   :  { %896 = vadd.xlane.f32.xlu0 %v1479_v6 }
 0x1dc   :  { %1480 = vpow2.f32 %v935_v7  ;;  %v944_v9 = vcvt.s32.f32 %v942_v8  ;;  %v943_v18 = vcvt.s32.f32 %v941_v16 }
 0x1de   :  { %945 = vmin.xlane.f32.xlu1 %v944_v9 }
 0x1df   :  { %v976_v10 = vpop.xlane.xlu0 %975 }
 0x1e0   :  { %v977_v11 = vsub.f32 %v880_v61, %v976_v10  ;;  %v1375_v10 = vsel %vm1002_vm8, 1.0, %v1518_v25 }
 0x1e2   :  { %v1481_v12 = vpop.eup %1480  ;;  %v978_v13 = vmul.f32 1.442695, %v977_v11 }
 0x1e3   :  { %937 = vadd.xlane.f32.xlu0 %v1481_v12 }
 0x1e4   :  { %1482 = vpow2.f32 %v978_v13 }
 0x1ea   :  { %v1483_v14 = vpop.eup %1482 }
 0x1eb   :  { %980 = vadd.xlane.f32.xlu2 %v1483_v14 }
 0x1f7   :  { %903 = vperm.xlu1 %1473, %v901_v15  }
 0x24e   :  { %v897_v20 = vpop.xlane.xlu0 %896 }
 0x24f   :  { %1484 = vlog2.f32 %v897_v20 }
 0x251   :  { %v946_v17 = vpop.xlane.xlu1 %945 }
 0x252   :  { %vm947_vm2 = vcmp.eq.f32.partialorder %v944_v9, %v946_v17  ;;  %v952_v29 = vcvt.f32.s32 %v946_v17 }
 0x253   :  { %v948_v19 = vsel %vm947_vm2, %v943_v18, inf }
 0x254   :  { %949 = vmin.xlane.f32.xlu2 %v948_v19  ;;  %v953_v31 = vshll.u32 %v952_v29, 16 }
 0x255   :  { %v1485_v21 = vpop.eup %1484 }
 0x256   :  { %v899_v22 = vmul.f32 0.6931472, %v1485_v21  ;;  %v938_v41 = vpop.xlane.xlu0 %937 }
 0x257   :  { %v971_v9 = vmul.f32 0.95, %v938_v41 }
 0x258   :  { %v900_v24 = vsub.f32 %v893_v1, %v899_v22 }
 0x259   :  { %vm972_vm9 = vcmp.le.f32.partialorder %v971_v9, 1.0 }
 0x25e   :  { %v981_v28 = vpop.xlane.xlu2 %980 }
 0x25f   :  { %1486 = vlog2.f32 %v981_v28 }
 0x265   :  { %v1487_v35 = vpop.eup %1486 }
 0x266   :  { %v983_v38 = vmul.f32 0.6931472, %v1487_v35 }
 0x268   :  { %v984_v39 = vsub.f32 %v977_v11, %v983_v38  ;;  %v1374_v11 = vsel %vm972_vm9, 1.0, %v1518_v25 }
 0x269   :  { %v904_v23 = vpop.permute.xlu1 %903  ;;  %v1005_v13 = vmul.f32 %v1375_v10, %v1374_v11 }
 0x26a   :  { %vm905_vm3 = vcmp.eq.s32.totalorder %v1655_v51, %v904_v23 }
 0x26b   :  { %v1370_v26 = vsel %vm905_vm3, 1.0, %v1518_v25  ;;  %v1006_v15 = vrot.slane %v1005_v13, 4 }
 0x26c   :  { %v913_v27 = vmul.f32 %v1370_v26, %v900_v24 }
 0x26d   :  { %v1007_v17 = vadd.f32 %v1006_v15, %v1005_v13 }
 0x26e   :  { %914 = vadd.xlane.f32.xlu0 %v913_v27 }
 0x26f   :  { %v1008_v19 = vrot.slane %v1007_v17, 2 }
 0x271   :  { %v1009_v21 = vadd.f32 %v1008_v19, %v1007_v17 }
 0x273   :  { %v1010_v23 = vrot.slane %v1009_v21, 1 }
 0x2c7   :  { %v950_v30 = vpop.xlane.xlu2 %949 }
 0x2c8   :  { %v951_v32 = vcvt.f32.s32 %v950_v30  ;;  %v1011_v30 = vadd.f32 %v1010_v23, %v1009_v21 }
 0x2ca   :  { %v954_v33 = vadd.s32 %v953_v31, %v951_v32 }
 0x2cc   :  { %vm955_vm4 = vcmp.eq.s32.totalorder %v1655_v51, %v954_v33  ;;  %v1012_v12 = vcvt.s32.f32 %v954_v33 }
 0x2cd   :  { %v1372_v36 = vsel %vm955_vm4, 1.0, %v1518_v25 }
 0x2ce   :  { %v962_v37 = vmul.f32 %v1477_v34, %v1372_v36  ;;  %v985_v40 = vmul.f32 %v1372_v36, %v984_v39  ;;  %v1013_v14 = vmul.f32 %v1375_v10, %v1012_v12  ;;  %v1035_v36 = vsel %vm1034_vm14, %v1011_v30, 0.0 }
 0x2d0   :  { %963 = vadd.xlane.f32.xlu2 %v962_v37  ;;  %v1014_v16 = vrot.slane %v1013_v14, 4 }
 0x2d2   :  { %v1015_v18 = vadd.f32 %v1014_v16, %v1013_v14 }
 0x2d4   :  { %v1016_v20 = vrot.slane %v1015_v18, 2 }
 0x2d6   :  { %v1017_v22 = vadd.f32 %v1016_v20, %v1015_v18 }
 0x2d8   :  { %986 = vadd.xlane.f32.xlu2 %v985_v40 }
 0x2e1   :  { %v915_v43 = vpop.xlane.xlu0 %914 }
 0x2e2   :  { %v916_v45 = vsub.f32 0.0, %v915_v43 }
 0x2e4   :  { %v917_v46 = vmul.f32 %v1371_v44, %v916_v45 }
 0x2e6   :  { %v919_v47 = vsel %vm918_vm6, %v917_v46, 0.0 }
 0x2e7   :  { %920 = vadd.xlane.f32.xlu2 %v919_v47 }
 0x343   :  { %v964_v48 = vpop.xlane.xlu2 %963 }
 0x344   :  { %v966_v49 = vmul.f32 0.95, %v964_v48  ;;  %v965_v53 = vsub.f32 2.0, %v964_v48 }
 0x346   :  { %v967_v52 = vmul.f32 %v966_v49, %v938_v41 }
 0x348   :  { %vm968_vm7 = vcmp.ge.f32.partialorder %v965_v53, %v967_v52 }
 0x349   :  { %v1373_v50 = vsel %vm968_vm7, 1.0, %v1518_v25  ;;  %v1018_v25 = vrot.slane %v1017_v22, 1 }
 0x34b   :  { %v987_v54 = vpop.xlane.xlu2 %986  ;;  %v1019_v33 = vadd.f32 %v1018_v25, %v1017_v22 }
 0x34c   :  { %v988_v55 = vsub.f32 0.0, %v987_v54 }
 0x34d   :  { %v1038_v38 = vsel %vm1037_vm15, %v1019_v33, 0.0 }
 0x34e   :  { %v989_v56 = vmul.f32 %v1373_v50, %v988_v55 }
 0x350   :  { %v990_v57 = vmul.f32 %v1371_v44, %v989_v56 }
 0x352   :  { %v991_v58 = vsel %vm918_vm6, %v990_v57, 0.0 }
 0x353   :  { %992 = vadd.xlane.f32.xlu0 %v991_v58 }
 0x35a   :  { %v921_v59 = vpop.xlane.xlu2 %920 }
 0x35b   :  { %v922_v60 = vrot.slane %v921_v59, 4 }
 0x35d   :  { %v923_v61 = vadd.f32 %v922_v60, %v921_v59 }
 0x35f   :  { %v924_v62 = vrot.slane %v923_v61, 2 }
 0x361   :  { %v925_v63 = vadd.f32 %v924_v62, %v923_v61 }
 0x363   :  { %v926_v0 = vrot.slane %v925_v63, 1 }
 0x365   :  { %v927_v1 = vadd.f32 %v926_v0, %v925_v63 }
 0x367   :  { %1464 = vpush %v927_v1 }
 0x398   :  { %s1465_s6 = spop %1464 }
 0x399   :  { %s929_s29 = smul.f32 0.5, %s1465_s6 }
 0x39b   :  { %v1025_v24 = vstv %s929_s29 }
 0x39c   :  { %v1026_v28 = vsel %vm1024_vm10, %v1025_v24, 0.0 }
 0x3c6   :  { %v993_v2 = vpop.xlane.xlu0 %992 }
 0x3c7   :  { %v994_v3 = vrot.slane %v993_v2, 4 }
 0x3c9   :  { %v995_v4 = vadd.f32 %v994_v3, %v993_v2 }
 0x3cb   :  { %v996_v5 = vrot.slane %v995_v4, 2 }
 0x3cd   :  { %v997_v6 = vadd.f32 %v996_v5, %v995_v4 }
 0x3cf   :  { %v998_v7 = vrot.slane %v997_v6, 1 }
 0x3d1   :  { %v999_v8 = vadd.f32 %v998_v7, %v997_v6 }
 0x3d3   :  { %1466 = vpush %v999_v8 }
 0x404   :  { %s1467_s30 = spop %1466 }
 0x405   :  { %s1001_s9 = smul.f32 0.5, %s1467_s30 }
 0x407   :  { %s1021_s0 = sadd.f32 %s1001_s9, %s929_s29  ;;  %v1029_v27 = vstv %s1001_s9 }
 0x408   :  { %v1030_v32 = vsel %vm1028_vm12, %v1029_v27, 0.0 }
 0x409   :  { %v1022_v26 = vstv %s1021_s0 }
 0x40a   :  { %v1023_v29 = vsel %vm1020_vm11, %v1022_v26, 0.0 }
 0x40b   :  { %v1027_v31 = vadd.f32 %v1026_v28, %v1023_v29 }
 0x40d   :  { %v1031_v34 = vadd.f32 %v1030_v32, %v1027_v31 }
 0x40f   :  { %v1033_v35 = vsel %vm1032_vm13, %v1031_v34, 0.0 }
 0x410   :  { %v1036_v37 = vadd.f32 %v1035_v36, %v1033_v35 }
 0x412   :  { %v1039_v39 = vadd.f32 %v1038_v38, %v1036_v37 }
 0x414   :  { %1040 = vst [vmem:[%s1708_s8] sm:$0xff] %v1039_v39 }
 0x415   :  { %1049 = vsyncpa [#allocation3], 1 }

</bundles_post_ra>
